<compile_context>
chip_gen: v7x
topology: tpu7x:2x2x1
jax: 0.10.0
libtpu: 0.0.40
codegen_flags: <defaults>
</compile_context>

<pallas_src>
import jax
import jax.numpy as jnp
import numpy as np
from jax.experimental import pallas as pl
from jax.experimental.pallas import tpu as pltpu


def _round_up(x, m):
    return ((x + m - 1) // m) * m


# ---------------------------------------------------------------------------
# LSTM layer kernel: one grid step == one chunk of C time steps.
# ---------------------------------------------------------------------------
def lstm_chunk_kernel(x_ref, wih_ref, whh_ref, b_ref, out_ref,
                      h_sc, c_sc, pg_sc):
    """
    x_ref   : (C, Bp, Ip)    input chunk (time-major, padded)
    wih_ref : (Ip, 4*Hp)     W_ih^T, gate-striped, lane-aligned
    whh_ref : (Hp, 4*Hp)     W_hh^T, gate-striped, lane-aligned
    b_ref   : (1, 4*Hp)      b_ih + b_hh
    out_ref : (C, Bp, Hp)    hidden states of this chunk
    h_sc/c_sc : (Bp, Hp)     recurrent state, persists across chunks
    pg_sc   : (C, Bp, 4*Hp)  hoisted input-projection ("pregates") scratch
    """
    C, Bp, Ip = x_ref.shape
    Hp = h_sc.shape[1]

    @pl.when(pl.program_id(0) == 0)
    def _():
        h_sc[...] = jnp.zeros_like(h_sc)
        c_sc[...] = jnp.zeros_like(c_sc)

    # ---- Phase 1: hoisted input projection, one large MXU GEMM per chunk.
    x_flat = x_ref[...].reshape(C * Bp, Ip)
    pg = jnp.dot(x_flat.astype(wih_ref.dtype), wih_ref[...],
                 preferred_element_type=jnp.float32) + b_ref[...]
    pg_sc[...] = pg.reshape(C, Bp, 4 * Hp)

    # ---- Phase 2: latency-bound recurrence, one small matmul per step.
    @pl.loop(0, C)
    def _(t):
        h_prev = h_sc[...]
        gates = (jnp.dot(h_prev.astype(whh_ref.dtype), whh_ref[...],
                         preferred_element_type=jnp.float32)
                 + pg_sc[t])                                 # (Bp, 4Hp)
        # Lane-aligned gate slices (Hp % 128 == 0), PyTorch order i, f, g, o.
        i_g = jax.nn.sigmoid(gates[:, 0 * Hp:1 * Hp])
        f_g = jax.nn.sigmoid(gates[:, 1 * Hp:2 * Hp])
        g_g = jnp.tanh(gates[:, 2 * Hp:3 * Hp])
        o_g = jax.nn.sigmoid(gates[:, 3 * Hp:4 * Hp])
        c_new = f_g * c_sc[...] + i_g * g_g
        h_new = o_g * jnp.tanh(c_new)
        c_sc[...] = c_new
        h_sc[...] = h_new
        out_ref[t] = h_new.astype(out_ref.dtype)             # dense vreg store


def _pack_lstm_weights(w_ih, w_hh, b_ih, b_hh, Ip, Hp, dtype):
    """PyTorch (4H, in) weights -> transposed, gate-striped, zero-padded."""
    four_h, in_sz = w_ih.shape
    H = four_h // 4
    w_ih4 = jnp.pad(w_ih.reshape(4, H, in_sz),
                    ((0, 0), (0, Hp - H), (0, Ip - in_sz)))
    wih_t = jnp.transpose(w_ih4, (2, 0, 1)).reshape(Ip, 4 * Hp).astype(dtype)
    w_hh4 = jnp.pad(w_hh.reshape(4, H, H),
                    ((0, 0), (0, Hp - H), (0, Hp - H)))
    whh_t = jnp.transpose(w_hh4, (2, 0, 1)).reshape(Hp, 4 * Hp).astype(dtype)
    b = jnp.pad((b_ih + b_hh).reshape(4, H), ((0, 0), (0, Hp - H)))
    b = b.reshape(1, 4 * Hp).astype(jnp.float32)
    return wih_t, whh_t, b


def run_lstm_layer(x_tm, w_ih, w_hh, b_ih, b_hh, *, Hp, chunk,
                   matmul_dtype=jnp.float32):
    """x_tm: (T_pad, Bp, Ip) time-major, padded.  Returns (T_pad, Bp, Hp) f32."""
    T_pad, Bp, Ip = x_tm.shape
    C = chunk
    n_chunks = T_pad // C
    wih_t, whh_t, b = _pack_lstm_weights(w_ih, w_hh, b_ih, b_hh, Ip, Hp,
                                         matmul_dtype)

    wbytes = jnp.dtype(matmul_dtype).itemsize
    vmem_bytes = (2 * C * Bp * Ip * 4            # x blocks (double buffered)
                  + 2 * C * Bp * Hp * 4          # out blocks
                  + 2 * Ip * 4 * Hp * wbytes     # W_ih^T
                  + 2 * Hp * 4 * Hp * wbytes     # W_hh^T
                  + 2 * 4 * Hp * 4               # bias
                  + C * Bp * 4 * Hp * 4          # pregates scratch
                  + 2 * Bp * Hp * 4)             # h, c carries
    vmem_limit = min(int(1.3 * vmem_bytes) + (4 << 20), 64 << 20)

    grid_spec = pltpu.PrefetchScalarGridSpec(
        num_scalar_prefetch=0,
        grid=(n_chunks,),
        in_specs=[
            pl.BlockSpec((C, Bp, Ip), lambda c: (c, 0, 0)),
            pl.BlockSpec((Ip, 4 * Hp), lambda c: (0, 0)),
            pl.BlockSpec((Hp, 4 * Hp), lambda c: (0, 0)),
            pl.BlockSpec((1, 4 * Hp), lambda c: (0, 0)),
        ],
        out_specs=pl.BlockSpec((C, Bp, Hp), lambda c: (c, 0, 0)),
        scratch_shapes=[
            pltpu.VMEM((Bp, Hp), jnp.float32),           # h carry
            pltpu.VMEM((Bp, Hp), jnp.float32),           # c carry
            pltpu.VMEM((C, Bp, 4 * Hp), jnp.float32),    # pregates
        ],
    )
    return pl.pallas_call(
        lstm_chunk_kernel,
        out_shape=jax.ShapeDtypeStruct((T_pad, Bp, Hp), jnp.float32),
        grid_spec=grid_spec,
        compiler_params=pltpu.CompilerParams(
            dimension_semantics=("arbitrary",),      # recurrence => sequential
            vmem_limit_bytes=vmem_limit),
    )(x_tm, wih_t, whh_t, b)


# ---------------------------------------------------------------------------
# Projection kernel: row-tiled (N, Hp) @ (Hp, Ip) + b, parallel over row blocks
# ---------------------------------------------------------------------------
def proj_kernel(h_ref, w_ref, b_ref, out_ref):
    out_ref[...] = (jnp.dot(h_ref[...].astype(w_ref.dtype), w_ref[...],
                            preferred_element_type=jnp.float32)
                    + b_ref[...]).astype(out_ref.dtype)


def run_proj(h_flat, w_p, b_p, *, Ip, matmul_dtype=jnp.float32, row_block=512):
    """h_flat: (N, Hp) padded.  Returns (N, Ip) f32."""
    N, Hp = h_flat.shape
    I, H = w_p.shape
    wp_t = jnp.pad(jnp.transpose(w_p),
                   ((0, Hp - H), (0, Ip - I))).astype(matmul_dtype)
    b = jnp.pad(b_p, (0, Ip - I)).reshape(1, Ip).astype(jnp.float32)

    Rb = min(row_block, N)
    N_pad = _round_up(N, Rb)
    if N_pad != N:
        h_flat = jnp.pad(h_flat, ((0, N_pad - N), (0, 0)))

    grid_spec = pltpu.PrefetchScalarGridSpec(
        num_scalar_prefetch=0,
        grid=(N_pad // Rb,),
        in_specs=[
            pl.BlockSpec((Rb, Hp), lambda r: (r, 0)),
            pl.BlockSpec((Hp, Ip), lambda r: (0, 0)),
            pl.BlockSpec((1, Ip), lambda r: (0, 0)),
        ],
        out_specs=pl.BlockSpec((Rb, Ip), lambda r: (r, 0)),
    )
    out = pl.pallas_call(
        proj_kernel,
        out_shape=jax.ShapeDtypeStruct((N_pad, Ip), jnp.float32),
        grid_spec=grid_spec,
        compiler_params=pltpu.CompilerParams(
            dimension_semantics=("parallel",)),      # 2nd TC on v7x
    )(h_flat, wp_t, b)
    return out[:N]


# ---------------------------------------------------------------------------
# Full ApcLstm forward
# ---------------------------------------------------------------------------
def apc_lstm_forward(feat, params, *, matmul_dtype=jnp.float32, chunk=128):
    """feat: (B, T, input_size) batch_first, like the PyTorch module.
       Returns (hidden (B, T, H), proj (B, T, input_size))."""
    B, T, I = feat.shape
    H = params["lstm"][0]["w_hh"].shape[1]
    Bp = _round_up(B, 8)
    Ip = _round_up(I, 128)
    Hp = _round_up(H, 128)
    C = min(chunk, T)
    T_pad = pl.cdiv(T, C) * C

    # Time-major + pad once at the boundary (padding is exact zeros).
    x = jnp.transpose(feat, (1, 0, 2)).astype(jnp.float32)
    x = jnp.pad(x, ((0, T_pad - T), (0, Bp - B), (0, Ip - I)))

    # TODO(synk): fuse the per-layer pallas_calls (and the projection) into one
    # kernel so inter-layer (T, B, H) activations stay in VMEM instead of HBM.
    for layer in params["lstm"]:
        x = run_lstm_layer(x, layer["w_ih"], layer["w_hh"],
                           layer["b_ih"], layer["b_hh"],
                           Hp=Hp, chunk=C, matmul_dtype=matmul_dtype)

    hidden = jnp.transpose(x[:T, :B, :H], (1, 0, 2))               # (B, T, H)
    proj_flat = run_proj(x.reshape(T_pad * Bp, Hp),
                         params["proj_w"], params["proj_b"],
                         Ip=Ip, matmul_dtype=matmul_dtype)
    proj = jnp.transpose(proj_flat.reshape(T_pad, Bp, Ip)[:T, :B, :I],
                         (1, 0, 2))                                # (B, T, I)
    return hidden, proj


# ---------------------------------------------------------------------------
# Pure-JAX reference (lax.scan) for correctness check
# ---------------------------------------------------------------------------
def ref_forward(feat, params):
    B, T, _ = feat.shape
    out = jnp.transpose(feat, (1, 0, 2))               # (T, B, I)
    for layer in params["lstm"]:
        w_ih, w_hh = layer["w_ih"], layer["w_hh"]
        b = layer["b_ih"] + layer["b_hh"]
        H = w_hh.shape[1]

        def step(carry, xt):
            h, c = carry
            gates = xt @ w_ih.T + h @ w_hh.T + b
            i = jax.nn.sigmoid(gates[:, :H])
            f = jax.nn.sigmoid(gates[:, H:2 * H])
            g = jnp.tanh(gates[:, 2 * H:3 * H])
            o = jax.nn.sigmoid(gates[:, 3 * H:])
            c = f * c + i * g
            h = o * jnp.tanh(c)
            return (h, c), h

        init = (jnp.zeros((B, H), jnp.float32), jnp.zeros((B, H), jnp.float32))
        _, out = jax.lax.scan(step, init, out)
    hidden = jnp.transpose(out, (1, 0, 2))
    proj = hidden @ params["proj_w"].T + params["proj_b"]
    return hidden, proj


# ---------------------------------------------------------------------------
# Deterministic parameter init (PyTorch-style U(-1/sqrt(H), 1/sqrt(H)))
# ---------------------------------------------------------------------------
def init_params(key, input_size, hidden_size, num_layers):
    k = 1.0 / np.sqrt(hidden_size)
    params = {"lstm": []}
    for layer in range(num_layers):
        in_sz = input_size if layer == 0 else hidden_size
        key, k1, k2, k3, k4 = jax.random.split(key, 5)
        params["lstm"].append({
            "w_ih": jax.random.uniform(k1, (4 * hidden_size, in_sz),
                                       jnp.float32, -k, k),
            "w_hh": jax.random.uniform(k2, (4 * hidden_size, hidden_size),
                                       jnp.float32, -k, k),
            "b_ih": jax.random.uniform(k3, (4 * hidden_size,),
                                       jnp.float32, -k, k),
            "b_hh": jax.random.uniform(k4, (4 * hidden_size,),
                                       jnp.float32, -k, k),
        })
    key, k5, k6 = jax.random.split(key, 3)
    params["proj_w"] = jax.random.uniform(k5, (input_size, hidden_size),
                                          jnp.float32, -k, k)
    params["proj_b"] = jax.random.uniform(k6, (input_size,),
                                          jnp.float32, -k, k)
    return params


if __name__ == "__main__":
    B, T, INPUT, HIDDEN, LAYERS = 2, 8, 16, 32, 2

    key = jax.random.PRNGKey(0)
    key, pkey, xkey = jax.random.split(key, 3)
    params = init_params(pkey, INPUT, HIDDEN, LAYERS)
    feat = jax.random.normal(xkey, (B, T, INPUT), jnp.float32)

    fwd = jax.jit(apc_lstm_forward)
    hidden, proj = fwd(feat, params)
    hidden = jax.block_until_ready(hidden)
    proj = jax.block_until_ready(proj)

    hidden_ref, proj_ref = ref_forward(feat, params)
    np.testing.assert_allclose(np.asarray(hidden), np.asarray(hidden_ref),
                               rtol=1e-3, atol=1e-4)
    np.testing.assert_allclose(np.asarray(proj), np.asarray(proj_ref),
                               rtol=1e-3, atol=1e-4)

    assert hidden.shape == (B, T, HIDDEN)
    assert proj.shape == (B, T, INPUT)
    print("KERNEL_OK")
</pallas_src>

<mosaic_0001>
module attributes {stable_mosaic.version = 11 : i64} {
  func.func @lstm_chunk_kernel(%arg0: i32, %arg1: memref<8x8x128xf32, #tpu.memory_space<vmem>>, %arg2: memref<128x512xf32, #tpu.memory_space<vmem>>, %arg3: memref<128x512xf32, #tpu.memory_space<vmem>>, %arg4: memref<1x512xf32, #tpu.memory_space<vmem>>, %arg5: memref<8x8x128xf32, #tpu.memory_space<vmem>>, %arg6: memref<8x128xf32, #tpu.memory_space<vmem>>, %arg7: memref<8x128xf32, #tpu.memory_space<vmem>>, %arg8: memref<8x8x512xf32, #tpu.memory_space<vmem>>) attributes {dimension_semantics = [#tpu.dimension_semantics<arbitrary>], iteration_bounds = array<i64: 1>, scalar_prefetch = 0 : i64, scratch_operands = 3 : i64, tpu.core_type = #tpu.core_type<tc>, window_params = [{transform_indices = @transform_0, window_bounds = array<i64: 8, 8, 128>}, {pipeline_mode = #tpu.pipeline_mode<synchronous>, transform_indices = @transform_1, window_bounds = array<i64: 128, 512>}, {pipeline_mode = #tpu.pipeline_mode<synchronous>, transform_indices = @transform_2, window_bounds = array<i64: 128, 512>}, {pipeline_mode = #tpu.pipeline_mode<synchronous>, transform_indices = @transform_3, window_bounds = array<i64: 1, 512>}, {transform_indices = @transform_4, window_bounds = array<i64: 8, 8, 128>}]} {
    %c0_i32 = arith.constant 0 : i32
    %0 = arith.cmpi eq, %arg0, %c0_i32 : i32
    %1 = arith.extui %0 : i1 to i32
    %c0_i32_0 = arith.constant 0 : i32
    %2 = arith.cmpi ne, %1, %c0_i32_0 : i32
    scf.if %2 {
      %cst_12 = arith.constant 0.000000e+00 : f32
      %13 = vector.broadcast %cst_12 : f32 to vector<8x128xf32>
      %c0_13 = arith.constant 0 : index
      %c0_14 = arith.constant 0 : index
      %14 = vector.load %arg6[%c0_13, %c0_14] : memref<8x128xf32, #tpu.memory_space<vmem>>, vector<8x128xf32>
      tpu.vector_store %arg6[%c0_13, %c0_14], %13 {strides = array<i32>} : memref<8x128xf32, #tpu.memory_space<vmem>>, vector<8x128xf32>,
      %cst_15 = arith.constant 0.000000e+00 : f32
      %15 = vector.broadcast %cst_15 : f32 to vector<8x128xf32>
      %c0_16 = arith.constant 0 : index
      %c0_17 = arith.constant 0 : index
      %16 = vector.load %arg7[%c0_16, %c0_17] : memref<8x128xf32, #tpu.memory_space<vmem>>, vector<8x128xf32>
      tpu.vector_store %arg7[%c0_16, %c0_17], %15 {strides = array<i32>} : memref<8x128xf32, #tpu.memory_space<vmem>>, vector<8x128xf32>,
    } else {
    }
    %c0 = arith.constant 0 : index
    %c0_1 = arith.constant 0 : index
    %c0_2 = arith.constant 0 : index
    %3 = vector.load %arg1[%c0, %c0_1, %c0_2] : memref<8x8x128xf32, #tpu.memory_space<vmem>>, vector<8x8x128xf32>
    %4 = vector.shape_cast %3 : vector<8x8x128xf32> to vector<64x128xf32>
    %c0_3 = arith.constant 0 : index
    %c0_4 = arith.constant 0 : index
    %5 = vector.load %arg2[%c0_3, %c0_4] : memref<128x512xf32, #tpu.memory_space<vmem>>, vector<128x512xf32>
    %cst = arith.constant dense<0.000000e+00> : vector<64x512xf32>
    %6 = tpu.matmul %4, %5, %cst {dimension_numbers = #tpu.dot_dimension_numbers<[1], [0], [0], [1], [0, 0, 1, 1], [], []>} : vector<64x128xf32>, vector<128x512xf32>, vector<64x512xf32> -> vector<64x512xf32>
    %c0_5 = arith.constant 0 : index
    %c0_6 = arith.constant 0 : index
    %7 = vector.load %arg4[%c0_5, %c0_6] : memref<1x512xf32, #tpu.memory_space<vmem>>, vector<1x512xf32>
    %8 = vector.broadcast %7 : vector<1x512xf32> to vector<64x512xf32>
    %9 = arith.addf %6, %8 : vector<64x512xf32>
    %10 = vector.shape_cast %9 : vector<64x512xf32> to vector<8x8x512xf32>
    %c0_7 = arith.constant 0 : index
    %c0_8 = arith.constant 0 : index
    %c0_9 = arith.constant 0 : index
    %11 = vector.load %arg8[%c0_7, %c0_8, %c0_9] : memref<8x8x512xf32, #tpu.memory_space<vmem>>, vector<8x8x512xf32>
    tpu.vector_store %arg8[%c0_7, %c0_8, %c0_9], %10 {strides = array<i32>} : memref<8x8x512xf32, #tpu.memory_space<vmem>>, vector<8x8x512xf32>,
    %c0_i32_10 = arith.constant 0 : i32
    %c8_i32 = arith.constant 8 : i32
    %12 = arith.addi %c0_i32_10, %c8_i32 : i32
    %c1_i32 = arith.constant 1 : i32
    scf.for %arg9 = %c0_i32_10 to %12 step %c1_i32  : i32 {
      %c1_i32_12 = arith.constant 1 : i32
      %13 = arith.muli %arg9, %c1_i32_12 : i32
      %c0_i32_13 = arith.constant 0 : i32
      %14 = arith.addi %c0_i32_13, %13 : i32
      %c0_14 = arith.constant 0 : index
      %c0_15 = arith.constant 0 : index
      %15 = vector.load %arg6[%c0_14, %c0_15] : memref<8x128xf32, #tpu.memory_space<vmem>>, vector<8x128xf32>
      %c0_16 = arith.constant 0 : index
      %c0_17 = arith.constant 0 : index
      %16 = vector.load %arg3[%c0_16, %c0_17] : memref<128x512xf32, #tpu.memory_space<vmem>>, vector<128x512xf32>
      %cst_18 = arith.constant dense<0.000000e+00> : vector<8x512xf32>
      %17 = tpu.matmul %15, %16, %cst_18 {dimension_numbers = #tpu.dot_dimension_numbers<[1], [0], [0], [1], [0, 0, 1, 1], [], []>} : vector<8x128xf32>, vector<128x512xf32>, vector<8x512xf32> -> vector<8x512xf32>
      %18 = arith.index_cast %14 : i32 to index
      %c0_19 = arith.constant 0 : index
      %c0_20 = arith.constant 0 : index
      %19 = vector.load %arg8[%18, %c0_19, %c0_20] : memref<8x8x512xf32, #tpu.memory_space<vmem>>, vector<1x8x512xf32>
      %20 = vector.shape_cast %19 : vector<1x8x512xf32> to vector<8x512xf32>
      %21 = arith.addf %17, %20 : vector<8x512xf32>
      %22 = vector.extract_strided_slice %21 {offsets = [0, 0], sizes = [8, 128], strides = [1, 1]} : vector<8x512xf32> to vector<8x128xf32>
      %23 = arith.negf %22 : vector<8x128xf32>
      %24 = math.exp %23 : vector<8x128xf32>
      %cst_21 = arith.constant 1.000000e+00 : f32
      %25 = vector.broadcast %cst_21 : f32 to vector<8x128xf32>
      %26 = arith.addf %25, %24 : vector<8x128xf32>
      %27 = arith.divf %25, %26 : vector<8x128xf32>
      %28 = vector.extract_strided_slice %21 {offsets = [0, 128], sizes = [8, 128], strides = [1, 1]} : vector<8x512xf32> to vector<8x128xf32>
      %29 = arith.negf %28 : vector<8x128xf32>
      %30 = math.exp %29 : vector<8x128xf32>
      %cst_22 = arith.constant 1.000000e+00 : f32
      %31 = vector.broadcast %cst_22 : f32 to vector<8x128xf32>
      %32 = arith.addf %31, %30 : vector<8x128xf32>
      %33 = arith.divf %31, %32 : vector<8x128xf32>
      %34 = vector.extract_strided_slice %21 {offsets = [0, 256], sizes = [8, 128], strides = [1, 1]} : vector<8x512xf32> to vector<8x128xf32>
      %35 = math.tanh %34 : vector<8x128xf32>
      %36 = vector.extract_strided_slice %21 {offsets = [0, 384], sizes = [8, 128], strides = [1, 1]} : vector<8x512xf32> to vector<8x128xf32>
      %37 = arith.negf %36 : vector<8x128xf32>
      %38 = math.exp %37 : vector<8x128xf32>
      %cst_23 = arith.constant 1.000000e+00 : f32
      %39 = vector.broadcast %cst_23 : f32 to vector<8x128xf32>
      %40 = arith.addf %39, %38 : vector<8x128xf32>
      %41 = arith.divf %39, %40 : vector<8x128xf32>
      %c0_24 = arith.constant 0 : index
      %c0_25 = arith.constant 0 : index
      %42 = vector.load %arg7[%c0_24, %c0_25] : memref<8x128xf32, #tpu.memory_space<vmem>>, vector<8x128xf32>
      %43 = arith.mulf %33, %42 : vector<8x128xf32>
      %44 = arith.mulf %27, %35 : vector<8x128xf32>
      %45 = arith.addf %43, %44 : vector<8x128xf32>
      %46 = math.tanh %45 : vector<8x128xf32>
      %47 = arith.mulf %41, %46 : vector<8x128xf32>
      %c0_26 = arith.constant 0 : index
      %c0_27 = arith.constant 0 : index
      %48 = vector.load %arg7[%c0_26, %c0_27] : memref<8x128xf32, #tpu.memory_space<vmem>>, vector<8x128xf32>
      tpu.vector_store %arg7[%c0_26, %c0_27], %45 {strides = array<i32>} : memref<8x128xf32, #tpu.memory_space<vmem>>, vector<8x128xf32>,
      %c0_28 = arith.constant 0 : index
      %c0_29 = arith.constant 0 : index
      %49 = vector.load %arg6[%c0_28, %c0_29] : memref<8x128xf32, #tpu.memory_space<vmem>>, vector<8x128xf32>
      tpu.vector_store %arg6[%c0_28, %c0_29], %47 {strides = array<i32>} : memref<8x128xf32, #tpu.memory_space<vmem>>, vector<8x128xf32>,
      %50 = arith.index_cast %14 : i32 to index
      %c0_30 = arith.constant 0 : index
      %c0_31 = arith.constant 0 : index
      %51 = vector.load %arg5[%50, %c0_30, %c0_31] : memref<8x8x128xf32, #tpu.memory_space<vmem>>, vector<1x8x128xf32>
      %52 = vector.shape_cast %51 : vector<1x8x128xf32> to vector<8x128xf32>
      %53 = vector.shape_cast %47 : vector<8x128xf32> to vector<1x8x128xf32>
      tpu.vector_store %arg5[%50, %c0_30, %c0_31], %53 {strides = array<i32>} : memref<8x8x128xf32, #tpu.memory_space<vmem>>, vector<1x8x128xf32>,
    }
    %c8_i32_11 = arith.constant 8 : i32
    return
  }
  func.func @transform_0(%arg0: i32) -> (i32, i32, i32) {
    %c0_i32 = arith.constant 0 : i32
    %c0_i32_0 = arith.constant 0 : i32
    %c0_i32_1 = arith.constant 0 : i32
    return %arg0, %c0_i32, %c0_i32_0 : i32, i32, i32
  }
  func.func @transform_1(%arg0: i32) -> (i32, i32) {
    %c0_i32 = arith.constant 0 : i32
    %c0_i32_0 = arith.constant 0 : i32
    %c0_i32_1 = arith.constant 0 : i32
    return %c0_i32, %c0_i32_0 : i32, i32
  }
  func.func @transform_2(%arg0: i32) -> (i32, i32) {
    %c0_i32 = arith.constant 0 : i32
    %c0_i32_0 = arith.constant 0 : i32
    %c0_i32_1 = arith.constant 0 : i32
    return %c0_i32, %c0_i32_0 : i32, i32
  }
  func.func @transform_3(%arg0: i32) -> (i32, i32) {
    %c0_i32 = arith.constant 0 : i32
    %c0_i32_0 = arith.constant 0 : i32
    %c0_i32_1 = arith.constant 0 : i32
    return %c0_i32, %c0_i32_0 : i32, i32
  }
  func.func @transform_4(%arg0: i32) -> (i32, i32, i32) {
    %c0_i32 = arith.constant 0 : i32
    %c0_i32_0 = arith.constant 0 : i32
    %c0_i32_1 = arith.constant 0 : i32
    return %arg0, %c0_i32, %c0_i32_0 : i32, i32, i32
  }
}

module attributes {stable_mosaic.version = 11 : i64} {
  func.func @proj_kernel(%arg0: i32, %arg1: memref<64x128xf32, #tpu.memory_space<vmem>>, %arg2: memref<128x128xf32, #tpu.memory_space<vmem>>, %arg3: memref<1x128xf32, #tpu.memory_space<vmem>>, %arg4: memref<64x128xf32, #tpu.memory_space<vmem>>) attributes {dimension_semantics = [#tpu.dimension_semantics<parallel>], iteration_bounds = array<i64: 1>, scalar_prefetch = 0 : i64, scratch_operands = 0 : i64, tpu.core_type = #tpu.core_type<tc>, window_params = [{transform_indices = @transform_0, window_bounds = array<i64: 64, 128>}, {pipeline_mode = #tpu.pipeline_mode<synchronous>, transform_indices = @transform_1, window_bounds = array<i64: 128, 128>}, {pipeline_mode = #tpu.pipeline_mode<synchronous>, transform_indices = @transform_2, window_bounds = array<i64: 1, 128>}, {transform_indices = @transform_3, window_bounds = array<i64: 64, 128>}]} {
    %c0 = arith.constant 0 : index
    %c0_0 = arith.constant 0 : index
    %0 = vector.load %arg1[%c0, %c0_0] : memref<64x128xf32, #tpu.memory_space<vmem>>, vector<64x128xf32>
    %c0_1 = arith.constant 0 : index
    %c0_2 = arith.constant 0 : index
    %1 = vector.load %arg2[%c0_1, %c0_2] : memref<128x128xf32, #tpu.memory_space<vmem>>, vector<128x128xf32>
    %cst = arith.constant dense<0.000000e+00> : vector<64x128xf32>
    %2 = tpu.matmul %0, %1, %cst {dimension_numbers = #tpu.dot_dimension_numbers<[1], [0], [0], [1], [0, 0, 1, 1], [], []>} : vector<64x128xf32>, vector<128x128xf32>, vector<64x128xf32> -> vector<64x128xf32>
    %c0_3 = arith.constant 0 : index
    %c0_4 = arith.constant 0 : index
    %3 = vector.load %arg3[%c0_3, %c0_4] : memref<1x128xf32, #tpu.memory_space<vmem>>, vector<1x128xf32>
    %4 = vector.broadcast %3 : vector<1x128xf32> to vector<64x128xf32>
    %5 = arith.addf %2, %4 : vector<64x128xf32>
    %c0_5 = arith.constant 0 : index
    %c0_6 = arith.constant 0 : index
    %6 = vector.load %arg4[%c0_5, %c0_6] : memref<64x128xf32, #tpu.memory_space<vmem>>, vector<64x128xf32>
    tpu.vector_store %arg4[%c0_5, %c0_6], %5 {strides = array<i32>} : memref<64x128xf32, #tpu.memory_space<vmem>>, vector<64x128xf32>,
    return
  }
  func.func @transform_0(%arg0: i32) -> (i32, i32) {
    %c0_i32 = arith.constant 0 : i32
    %c0_i32_0 = arith.constant 0 : i32
    return %arg0, %c0_i32 : i32, i32
  }
  func.func @transform_1(%arg0: i32) -> (i32, i32) {
    %c0_i32 = arith.constant 0 : i32
    %c0_i32_0 = arith.constant 0 : i32
    %c0_i32_1 = arith.constant 0 : i32
    return %c0_i32, %c0_i32_0 : i32, i32
  }
  func.func @transform_2(%arg0: i32) -> (i32, i32) {
    %c0_i32 = arith.constant 0 : i32
    %c0_i32_0 = arith.constant 0 : i32
    %c0_i32_1 = arith.constant 0 : i32
    return %c0_i32, %c0_i32_0 : i32, i32
  }
  func.func @transform_3(%arg0: i32) -> (i32, i32) {
    %c0_i32 = arith.constant 0 : i32
    %c0_i32_0 = arith.constant 0 : i32
    return %arg0, %c0_i32 : i32, i32
  }
}

</mosaic_0001>

<bundles_post_ra>
// kernel: apc_lstm_forward.5
= control target key start
LH: loop header
LB: loop body
LE: loop exit
PB: predicated region body
PF: predicated region fallthrough
CT: control target
= control target key end

     0   :  { %s398_s1 = inlined_call_operand.vmem [shape: f32[128,128], index: 1, kind: input, shape index: {}]   ;;  %s399_s0 = inlined_call_operand.vmem [shape: f32[64,128], index: 0, kind: input, shape index: {}]   ;;  %s400_s2 = inlined_call_operand.vmem [shape: f32[1,128], index: 2, kind: input, shape index: {}]   ;;  %s401_s3 = inlined_call_operand.vmem [shape: f32[64,128], index: 3, kind: output, shape index: {}]  }
   0x1   :  { %v22_v0 = vld [vmem:[%s398_s1] sm:$0xff]  ;;  %v23_v1 = vld [vmem:[%s398_s1 + $0x8] sm:$0xff]  ;;  %v24_v2 = vld [vmem:[%s398_s1 + $0x10] sm:$0xff] }
   0x2   :  { %v231_v3 = vpack.c.bf16 %v23_v1, %v22_v0  ;;  %v25_v4 = vld [vmem:[%s398_s1 + $0x18] sm:$0xff]  ;;  %v26_v6 = vld [vmem:[%s398_s1 + $0x20] sm:$0xff]  ;;  %v27_v7 = vld [vmem:[%s398_s1 + $0x28] sm:$0xff] }
   0x3   :  { %v235_v5 = vpack.c.bf16 %v25_v4, %v24_v2  ;;  %v239_v8 = vpack.c.bf16 %v27_v7, %v26_v6  ;;  %v14_v9 = vld [vmem:[%s399_s0] sm:$0xff]  ;;  %v28_v11 = vld [vmem:[%s398_s1 + $0x30] sm:$0xff]  ;;  %v29_v12 = vld [vmem:[%s398_s1 + $0x38] sm:$0xff] }
   0x4   :  { %232 = vmatprep.subr.bf16.mxu0 %v231_v3  ;;  %263 = vmatprep.subr.bf16.mxu1 %v231_v3  ;;  %v18_v10 = vld [vmem:[%s399_s0 + $0x20] sm:$0xff]  ;;  %v243_v13 = vpack.c.bf16 %v29_v12, %v28_v11  ;;  %v31_v15 = vld [vmem:[%s398_s1 + $0x48] sm:$0xff]  ;;  %v32_v17 = vld [vmem:[%s398_s1 + $0x50] sm:$0xff] }
   0x5   :  { %234 = vmatpush3.bf16.msra.mxu0 %v231_v3  ;;  %271 = vmatpush3.bf16.msra.mxu1 %v231_v3  ;;  %v30_v14 = vld [vmem:[%s398_s1 + $0x40] sm:$0xff]  ;;  %v33_v18 = vld [vmem:[%s398_s1 + $0x58] sm:$0xff]  ;;  %v35_v21 = vld [vmem:[%s398_s1 + $0x68] sm:$0xff] }
   0x6   :  { %236 = vmatprep.subr.bf16.mxu0 %v235_v5  ;;  %264 = vmatprep.subr.bf16.mxu1 %v235_v5  ;;  %v247_v16 = vpack.c.bf16 %v31_v15, %v30_v14  ;;  %v251_v19 = vpack.c.bf16 %v33_v18, %v32_v17  ;;  %v34_v20 = vld [vmem:[%s398_s1 + $0x60] sm:$0xff]  ;;  %v36_v23 = vld [vmem:[%s398_s1 + $0x70] sm:$0xff]  ;;  %v37_v24 = vld [vmem:[%s398_s1 + $0x78] sm:$0xff] }
   0x7   :  { %219 = vmatprep.mubr.f32.mxu0 %v14_v9  ;;  %225 = vmatprep.mubr.f32.mxu1 %v18_v10  ;;  %v255_v22 = vpack.c.bf16 %v35_v21, %v34_v20  ;;  %v259_v25 = vpack.c.bf16 %v37_v24, %v36_v23  ;;  %v15_v26 = vld [vmem:[%s399_s0 + $0x8] sm:$0xff]  ;;  %v16_v28 = vld [vmem:[%s399_s0 + $0x10] sm:$0xff]  ;;  %v17_v30 = vld [vmem:[%s399_s0 + $0x18] sm:$0xff] }
   0x8   :  { %v19_v27 = vld [vmem:[%s399_s0 + $0x28] sm:$0xff]  ;;  %v20_v29 = vld [vmem:[%s399_s0 + $0x30] sm:$0xff]  ;;  %v21_v31 = vld [vmem:[%s399_s0 + $0x38] sm:$0xff] }
   0x9   :  { %238 = vmatpush3.bf16.msra.mxu0 %v235_v5  ;;  %272 = vmatpush3.bf16.msra.mxu1 %v235_v5  ;;  %v162_v32 = vld [vmem:[%s400_s2] ss:$0 sm:$0xff] }
   0xa   :  { %240 = vmatprep.subr.bf16.mxu0 %v239_v8  ;;  %265 = vmatprep.subr.bf16.mxu1 %v239_v8 }
   0xd   :  { %242 = vmatpush3.bf16.msra.mxu0 %v239_v8  ;;  %273 = vmatpush3.bf16.msra.mxu1 %v239_v8 }
   0xe   :  { %244 = vmatprep.subr.bf16.mxu0 %v243_v13  ;;  %266 = vmatprep.subr.bf16.mxu1 %v243_v13 }
  0x11   :  { %246 = vmatpush3.bf16.msra.mxu0 %v243_v13  ;;  %274 = vmatpush3.bf16.msra.mxu1 %v243_v13 }
  0x12   :  { %248 = vmatprep.subr.bf16.mxu0 %v247_v16  ;;  %267 = vmatprep.subr.bf16.mxu1 %v247_v16 }
  0x15   :  { %250 = vmatpush3.bf16.msra.mxu0 %v247_v16  ;;  %275 = vmatpush3.bf16.msra.mxu1 %v247_v16 }
  0x16   :  { %252 = vmatprep.subr.bf16.mxu0 %v251_v19  ;;  %268 = vmatprep.subr.bf16.mxu1 %v251_v19 }
  0x19   :  { %254 = vmatpush3.bf16.msra.mxu0 %v251_v19  ;;  %276 = vmatpush3.bf16.msra.mxu1 %v251_v19 }
  0x1a   :  { %256 = vmatprep.subr.bf16.mxu0 %v255_v22  ;;  %269 = vmatprep.subr.bf16.mxu1 %v255_v22 }
  0x1d   :  { %258 = vmatpush3.bf16.msra.mxu0 %v255_v22  ;;  %277 = vmatpush3.bf16.msra.mxu1 %v255_v22 }
  0x1e   :  { %260 = vmatprep.subr.bf16.mxu0 %v259_v25  ;;  %270 = vmatprep.subr.bf16.mxu1 %v259_v25 }
  0x21   :  { %262 = vmatpush3.bf16.msra.mxu0 %v259_v25  ;;  %278 = vmatpush3.bf16.msra.mxu1 %v259_v25 }
  0x24   :  { %220 = vmatmul.mubr.f32.vlgmr.msra.gmra.mrb[0].mxu0 %v15_v26  ;;  %226 = vmatmul.mubr.f32.vlgmr.msra.gmra.mrb[0].mxu1 %v19_v27 }
  0x25   :  { %222 = vmatprep.mubr.f32.mxu0 %v16_v28  ;;  %228 = vmatprep.mubr.f32.mxu1 %v20_v29 }
  0x28   :  { %223 = vmatmul.mubr.f32.gmra.mrb[2].mxu0 %v17_v30  ;;  %229 = vmatmul.mubr.f32.gmra.mrb[2].mxu1 %v21_v31 }
  0xf7   :  { %v221_v33 = vpop.f32.mrb[0].mxu0  ;;  %v227_v34 = vpop.f32.mrb[0].mxu1 }
  0xf8   :  { %v117_v35 = vadd.f32 %v221_v33, %v162_v32  ;;  %v137_v36 = vadd.f32 %v227_v34, %v162_v32  ;;  %v111_v37 = vpop.f32.mrb[1].mxu0  ;;  %v131_v38 = vpop.f32.mrb[1].mxu1 }
  0xf9   :  { %v112_v39 = vadd.f32 %v162_v32, %v111_v37  ;;  %v132_v40 = vadd.f32 %v162_v32, %v131_v38 }
  0xfa   :  { %151 = vst [vmem:[%s401_s3 + $0x8] sm:$0xff] %v117_v35  ;;  %155 = vst [vmem:[%s401_s3 + $0x28] sm:$0xff] %v137_v36 }
  0xfb   :  { %150 = vst [vmem:[%s401_s3] sm:$0xff] %v112_v39  ;;  %154 = vst [vmem:[%s401_s3 + $0x20] sm:$0xff] %v132_v40  ;;  %v224_v41 = vpop.f32.mrb[2].mxu0  ;;  %v230_v42 = vpop.f32.mrb[2].mxu1 }
  0xfc   :  { %v127_v43 = vadd.f32 %v224_v41, %v162_v32  ;;  %v147_v44 = vadd.f32 %v230_v42, %v162_v32  ;;  %v121_v45 = vpop.f32.mrb[3].mxu0  ;;  %v141_v46 = vpop.f32.mrb[3].mxu1 }
  0xfd   :  { %v122_v47 = vadd.f32 %v162_v32, %v121_v45  ;;  %v142_v48 = vadd.f32 %v162_v32, %v141_v46 }
  0xfe   :  { %153 = vst [vmem:[%s401_s3 + $0x18] sm:$0xff] %v127_v43  ;;  %157 = vst [vmem:[%s401_s3 + $0x38] sm:$0xff] %v147_v44 }
  0xff   :  { %152 = vst [vmem:[%s401_s3 + $0x10] sm:$0xff] %v122_v47  ;;  %156 = vst [vmem:[%s401_s3 + $0x30] sm:$0xff] %v142_v48 }

// kernel: apc_lstm_forward.3
= control target key start
LH: loop header
LB: loop body
LE: loop exit
PB: predicated region body
PF: predicated region fallthrough
CT: control target
= control target key end

     0   :  { %v807_v3 = vmov 0.0   ;;  %s1316_s1 = inlined_call_operand.vmem [shape: f32[128,512], index: 1, kind: input, shape index: {}]   ;;  %s1317_s2 = inlined_call_operand.vmem [shape: f32[128,512], index: 2, kind: input, shape index: {}]   ;;  %s1318_s4 = inlined_call_operand.vmem [shape: f32[8,8,128], index: 4, kind: output, shape index: {}]   ;;  %s1319_s0 = inlined_call_operand.vmem [shape: f32[8,8,128], index: 0, kind: input, shape index: {}]   ;;  %s1320_s3 = inlined_call_operand.vmem [shape: f32[1,512], index: 3, kind: input, shape index: {}]  }
   0x1   :  { %v32_v0 = vld [vmem:[%s1316_s1 + $0x8] sm:$0xff]  ;;  %v34_v2 = vld [vmem:[%s1316_s1 + $0x18] sm:$0xff]  ;;  %21 = vst [vmem:[#allocation2] sm:$0xff] %v807_v3  ;;  %22 = vst [vmem:[#allocation3] sm:$0xff] %v807_v3  ;;  %181 = vmatprep.mubr.f32.mxu0 %v807_v3  ;;  %294 = vmatprep.mubr.f32.mxu1 %v807_v3 }
   0x2   :  { %v36_v1 = vld [vmem:[%s1316_s1 + $0x28] sm:$0xff]  ;;  %v38_v5 = vld [vmem:[%s1316_s1 + $0x38] sm:$0xff]  ;;  %v31_v6 = vld [vmem:[%s1316_s1] sm:$0xff] }
   0x3   :  { %v645_v4 = vpack.c.bf16 %v36_v1, %v32_v0  ;;  %v35_v7 = vld [vmem:[%s1316_s1 + $0x20] sm:$0xff]  ;;  %v677_v8 = vpack.c.bf16 %v38_v5, %v34_v2  ;;  %v33_v10 = vld [vmem:[%s1316_s1 + $0x10] sm:$0xff]  ;;  %v40_v12 = vld [vmem:[%s1316_s1 + $0x48] sm:$0xff] }
   0x4   :  { %v647_v9 = vpack.c.bf16 %v35_v7, %v31_v6  ;;  %v37_v11 = vld [vmem:[%s1316_s1 + $0x30] sm:$0xff]  ;;  %v44_v14 = vld [vmem:[%s1316_s1 + $0x68] sm:$0xff]  ;;  %v42_v15 = vld [vmem:[%s1316_s1 + $0x58] sm:$0xff] }
   0x5   :  { %646 = vmatprep.subr.bf16.mxu0 %v645_v4  ;;  %v679_v13 = vpack.c.bf16 %v37_v11, %v33_v10  ;;  %v46_v16 = vld [vmem:[%s1316_s1 + $0x78] sm:$0xff]  ;;  %678 = vmatprep.subr.bf16.mxu1 %v677_v8  ;;  %v649_v17 = vpack.c.bf16 %v44_v14, %v40_v12  ;;  %v39_v19 = vld [vmem:[%s1316_s1 + $0x40] sm:$0xff]  ;;  %v41_v21 = vld [vmem:[%s1316_s1 + $0x50] sm:$0xff] }
   0x6   :  { %648 = vmatpush1.bf16.msra.mxu0 %v647_v9  ;;  %v681_v18 = vpack.c.bf16 %v46_v16, %v42_v15  ;;  %v43_v20 = vld [vmem:[%s1316_s1 + $0x60] sm:$0xff]  ;;  %v45_v23 = vld [vmem:[%s1316_s1 + $0x70] sm:$0xff]  ;;  %v48_v24 = vld [vmem:[%s1316_s1 + $0x88] sm:$0xff] }
   0x7   :  { %680 = vmatpush1.bf16.msra.mxu1 %v679_v13  ;;  %v651_v22 = vpack.c.bf16 %v43_v20, %v39_v19  ;;  %v52_v25 = vld [vmem:[%s1316_s1 + $0xa8] sm:$0xff]  ;;  %650 = vmatprep.subr.bf16.mxu0 %v649_v17  ;;  %v683_v26 = vpack.c.bf16 %v45_v23, %v41_v21  ;;  %v50_v28 = vld [vmem:[%s1316_s1 + $0x98] sm:$0xff]  ;;  %v47_v30 = vld [vmem:[%s1316_s1 + $0x80] sm:$0xff] }
   0x8   :  { %682 = vmatprep.subr.bf16.mxu1 %v681_v18  ;;  %v653_v27 = vpack.c.bf16 %v52_v25, %v48_v24  ;;  %v54_v29 = vld [vmem:[%s1316_s1 + $0xb8] sm:$0xff]  ;;  %v51_v32 = vld [vmem:[%s1316_s1 + $0xa0] sm:$0xff]  ;;  %v49_v33 = vld [vmem:[%s1316_s1 + $0x90] sm:$0xff] }
   0x9   :  { %v685_v31 = vpack.c.bf16 %v54_v29, %v50_v28  ;;  %v53_v34 = vld [vmem:[%s1316_s1 + $0xb0] sm:$0xff]  ;;  %v655_v35 = vpack.c.bf16 %v51_v32, %v47_v30  ;;  %v56_v36 = vld [vmem:[%s1316_s1 + $0xc8] sm:$0xff]  ;;  %v58_v38 = vld [vmem:[%s1316_s1 + $0xd8] sm:$0xff] }
   0xa   :  { %652 = vmatpush1.bf16.msra.mxu0 %v651_v22  ;;  %v60_v37 = vld [vmem:[%s1316_s1 + $0xe8] sm:$0xff]  ;;  %v687_v39 = vpack.c.bf16 %v53_v34, %v49_v33  ;;  %v62_v41 = vld [vmem:[%s1316_s1 + $0xf8] sm:$0xff]  ;;  %v55_v42 = vld [vmem:[%s1316_s1 + $0xc0] sm:$0xff] }
   0xb   :  { %684 = vmatpush1.bf16.msra.mxu1 %v683_v26  ;;  %654 = vmatprep.subr.bf16.mxu0 %v653_v27  ;;  %v657_v40 = vpack.c.bf16 %v60_v37, %v56_v36  ;;  %v59_v43 = vld [vmem:[%s1316_s1 + $0xe0] sm:$0xff]  ;;  %v689_v44 = vpack.c.bf16 %v62_v41, %v58_v38  ;;  %v57_v45 = vld [vmem:[%s1316_s1 + $0xd0] sm:$0xff]  ;;  %v64_v47 = vld [vmem:[%s1316_s1 + $0x108] sm:$0xff] }
   0xc   :  { %686 = vmatprep.subr.bf16.mxu1 %v685_v31  ;;  %v61_v46 = vld [vmem:[%s1316_s1 + $0xf0] sm:$0xff]  ;;  %v68_v48 = vld [vmem:[%s1316_s1 + $0x128] sm:$0xff]  ;;  %v66_v49 = vld [vmem:[%s1316_s1 + $0x118] sm:$0xff]  ;;  %v659_v51 = vpack.c.bf16 %v59_v43, %v55_v42  ;;  %v97_v42 = vlaneseq }
   0xd   :  { %v70_v50 = vld [vmem:[%s1316_s1 + $0x138] sm:$0xff]  ;;  %v691_v52 = vpack.c.bf16 %v61_v46, %v57_v45  ;;  %v661_v53 = vpack.c.bf16 %v68_v48, %v64_v47  ;;  %v63_v54 = vld [vmem:[%s1316_s1 + $0x100] sm:$0xff]  ;;  %v65_v56 = vld [vmem:[%s1316_s1 + $0x110] sm:$0xff] }
   0xe   :  { %656 = vmatpush1.bf16.msra.mxu0 %v655_v35  ;;  %v67_v55 = vld [vmem:[%s1316_s1 + $0x120] sm:$0xff]  ;;  %v693_v57 = vpack.c.bf16 %v70_v50, %v66_v49  ;;  %v69_v58 = vld [vmem:[%s1316_s1 + $0x130] sm:$0xff]  ;;  %v72_v59 = vld [vmem:[%s1316_s1 + $0x148] sm:$0xff]  ;;  %v98_v43 = vshrl.u32 %v97_v42, 7 }
   0xf   :  { %688 = vmatpush1.bf16.msra.mxu1 %v687_v39  ;;  %658 = vmatprep.subr.bf16.mxu0 %v657_v40  ;;  %v76_v60 = vld [vmem:[%s1316_s1 + $0x168] sm:$0xff]  ;;  %v74_v61 = vld [vmem:[%s1316_s1 + $0x158] sm:$0xff]  ;;  %v663_v63 = vpack.c.bf16 %v67_v55, %v63_v54  ;;  %v695_v0 = vpack.c.bf16 %v69_v58, %v65_v56  ;;  %v71_v2 = vld [vmem:[%s1316_s1 + $0x140] sm:$0xff] }
  0x10   :  { %690 = vmatprep.subr.bf16.mxu1 %v689_v44  ;;  %v78_v62 = vld [vmem:[%s1316_s1 + $0x178] sm:$0xff]  ;;  %v665_v1 = vpack.c.bf16 %v76_v60, %v72_v59  ;;  %v75_v4 = vld [vmem:[%s1316_s1 + $0x160] sm:$0xff]  ;;  %v73_v5 = vld [vmem:[%s1316_s1 + $0x150] sm:$0xff]  ;;  %v99_v44 = vsub.s32 0, %v98_v43  ;;  %v107_v46 = vsub.s32 2, %v98_v43  ;;  %v103_v47 = vsub.s32 1, %v98_v43 }
  0x11   :  { %v697_v6 = vpack.c.bf16 %v78_v62, %v74_v61  ;;  %v77_v7 = vld [vmem:[%s1316_s1 + $0x170] sm:$0xff]  ;;  %v80_v8 = vld [vmem:[%s1316_s1 + $0x188] sm:$0xff]  ;;  %v82_v10 = vld [vmem:[%s1316_s1 + $0x198] sm:$0xff]  ;;  %v667_v12 = vpack.c.bf16 %v75_v4, %v71_v2  ;;  %v111_v48 = vsub.s32 3, %v98_v43 }
  0x12   :  { %660 = vmatpush1.bf16.msra.mxu0 %v659_v51  ;;  %v84_v9 = vld [vmem:[%s1316_s1 + $0x1a8] sm:$0xff]  ;;  %v86_v11 = vld [vmem:[%s1316_s1 + $0x1b8] sm:$0xff]  ;;  %v699_v13 = vpack.c.bf16 %v77_v7, %v73_v5  ;;  %v79_v15 = vld [vmem:[%s1316_s1 + $0x180] sm:$0xff] }
  0x13   :  { %692 = vmatpush1.bf16.msra.mxu1 %v691_v52  ;;  %662 = vmatprep.subr.bf16.mxu0 %v661_v53  ;;  %v669_v14 = vpack.c.bf16 %v84_v9, %v80_v8  ;;  %v83_v16 = vld [vmem:[%s1316_s1 + $0x1a0] sm:$0xff]  ;;  %v81_v17 = vld [vmem:[%s1316_s1 + $0x190] sm:$0xff]  ;;  %v701_v18 = vpack.c.bf16 %v86_v11, %v82_v10  ;;  %v88_v20 = vld [vmem:[%s1316_s1 + $0x1c8] sm:$0xff] }
  0x14   :  { %694 = vmatprep.subr.bf16.mxu1 %v693_v57  ;;  %v85_v19 = vld [vmem:[%s1316_s1 + $0x1b0] sm:$0xff]  ;;  %v92_v21 = vld [vmem:[%s1316_s1 + $0x1e8] sm:$0xff]  ;;  %v90_v22 = vld [vmem:[%s1316_s1 + $0x1d8] sm:$0xff]  ;;  %v671_v24 = vpack.c.bf16 %v83_v16, %v79_v15 }
  0x15   :  { %v94_v23 = vld [vmem:[%s1316_s1 + $0x1f8] sm:$0xff]  ;;  %v703_v25 = vpack.c.bf16 %v85_v19, %v81_v17  ;;  %v673_v26 = vpack.c.bf16 %v92_v21, %v88_v20  ;;  %v87_v27 = vld [vmem:[%s1316_s1 + $0x1c0] sm:$0xff]  ;;  %v89_v30 = vld [vmem:[%s1316_s1 + $0x1d0] sm:$0xff] }
  0x16   :  { %664 = vmatpush1.bf16.msra.mxu0 %v663_v63  ;;  %v91_v28 = vld [vmem:[%s1316_s1 + $0x1e0] sm:$0xff]  ;;  %v705_v29 = vpack.c.bf16 %v94_v23, %v90_v22  ;;  %v93_v31 = vld [vmem:[%s1316_s1 + $0x1f0] sm:$0xff]  ;;  %v24_v35 = vld [vmem:[%s1319_s0 + $0x8] sm:$0xff] }
  0x17   :  { %696 = vmatpush1.bf16.msra.mxu1 %v695_v0  ;;  %666 = vmatprep.subr.bf16.mxu0 %v665_v1  ;;  %v675_v32 = vpack.c.bf16 %v91_v28, %v87_v27  ;;  %v707_v33 = vpack.c.bf16 %v93_v31, %v89_v30  ;;  %v23_v34 = vld [vmem:[%s1319_s0] sm:$0xff]  ;;  %v25_v36 = vld [vmem:[%s1319_s0 + $0x10] sm:$0xff]  ;;  %v26_v37 = vld [vmem:[%s1319_s0 + $0x18] sm:$0xff] }
  0x18   :  { %698 = vmatprep.subr.bf16.mxu1 %v697_v6  ;;  %v27_v38 = vld [vmem:[%s1319_s0 + $0x20] sm:$0xff]  ;;  %v28_v39 = vld [vmem:[%s1319_s0 + $0x28] sm:$0xff]  ;;  %v29_v40 = vld [vmem:[%s1319_s0 + $0x30] sm:$0xff] }
  0x19   :  { %v30_v41 = vld [vmem:[%s1319_s0 + $0x38] sm:$0xff]  ;;  %v95_v45 = vld [vmem:[%s1320_s3] sm:$0xf]  ;;  %s1111_s0 = smov 0  }
  0x1a   :  { %668 = vmatpush1.bf16.msra.mxu0 %v667_v12  ;;  %v1071_v49 = vrot.slane %v95_v45, %v99_v44  ;;  %v1073_v50 = vrot.slane %v95_v45, %v107_v46  ;;  %v1075_v51 = vrot.slane %v95_v45, %v103_v47  ;;  %v1077_v52 = vrot.slane %v95_v45, %v111_v48 }
  0x1b   :  { %700 = vmatpush1.bf16.msra.mxu1 %v699_v13  ;;  %670 = vmatprep.subr.bf16.mxu0 %v669_v14 }
  0x1c   :  { %702 = vmatprep.subr.bf16.mxu1 %v701_v18 }
  0x1e   :  { %672 = vmatpush1.bf16.msra.mxu0 %v671_v24 }
  0x1f   :  { %704 = vmatpush1.bf16.msra.mxu1 %v703_v25  ;;  %674 = vmatprep.subr.bf16.mxu0 %v673_v26 }
  0x20   :  { %706 = vmatprep.subr.bf16.mxu1 %v705_v29 }
  0x22   :  { %676 = vmatpush1.bf16.msra.mxu0 %v675_v32 }
  0x23   :  { %708 = vmatpush1.bf16.msra.mxu1 %v707_v33 }
  0x25   :  { %182 = vmatmul.mubr.f32.vlgmr.msra.gmra.mrb[0].mxu0 %v23_v34 }
  0x26   :  { %295 = vmatmul.mubr.f32.vlgmr.msra.gmra.mrb[0].mxu1 %v23_v34  ;;  %187 = vmatprep.mubr.f32.mxu0 %v807_v3 }
  0x27   :  { %300 = vmatprep.mubr.f32.mxu1 %v807_v3 }
  0x29   :  { %188 = vmatmul.mubr.f32.gmra.mrb[2].mxu0 %v24_v35 }
  0x2a   :  { %301 = vmatmul.mubr.f32.gmra.mrb[2].mxu1 %v24_v35  ;;  %193 = vmatprep.mubr.f32.mxu0 %v807_v3 }
  0x2b   :  { %306 = vmatprep.mubr.f32.mxu1 %v807_v3 }
  0x2d   :  { %194 = vmatmul.mubr.f32.gmra.mrb[4].mxu0 %v25_v36 }
  0x2e   :  { %307 = vmatmul.mubr.f32.gmra.mrb[4].mxu1 %v25_v36  ;;  %199 = vmatprep.mubr.f32.mxu0 %v807_v3 }
  0x2f   :  { %312 = vmatprep.mubr.f32.mxu1 %v807_v3 }
  0x31   :  { %200 = vmatmul.mubr.f32.gmra.mrb[6].mxu0 %v26_v37 }
  0x32   :  { %313 = vmatmul.mubr.f32.gmra.mrb[6].mxu1 %v26_v37  ;;  %205 = vmatprep.mubr.f32.mxu0 %v807_v3 }
  0x33   :  { %318 = vmatprep.mubr.f32.mxu1 %v807_v3 }
  0x35   :  { %206 = vmatmul.mubr.f32.gmra.mrb[8].mxu0 %v27_v38 }
  0x36   :  { %319 = vmatmul.mubr.f32.gmra.mrb[8].mxu1 %v27_v38  ;;  %211 = vmatprep.mubr.f32.mxu0 %v807_v3 }
  0x37   :  { %324 = vmatprep.mubr.f32.mxu1 %v807_v3 }
  0x39   :  { %212 = vmatmul.mubr.f32.gmra.mrb[10].mxu0 %v28_v39 }
  0x3a   :  { %325 = vmatmul.mubr.f32.gmra.mrb[10].mxu1 %v28_v39  ;;  %217 = vmatprep.mubr.f32.mxu0 %v807_v3 }
  0x3b   :  { %330 = vmatprep.mubr.f32.mxu1 %v807_v3 }
  0x3d   :  { %218 = vmatmul.mubr.f32.gmra.mrb[12].mxu0 %v29_v40 }
  0x3e   :  { %331 = vmatmul.mubr.f32.gmra.mrb[12].mxu1 %v29_v40  ;;  %223 = vmatprep.mubr.f32.mxu0 %v807_v3 }
  0x3f   :  { %336 = vmatprep.mubr.f32.mxu1 %v807_v3 }
  0x41   :  { %224 = vmatmul.mubr.f32.gmra.mrb[14].mxu0 %v30_v41 }
  0x42   :  { %337 = vmatmul.mubr.f32.gmra.mrb[14].mxu1 %v30_v41 }
  0xf8   :  { %v183_v3 = vpop.f32.mrb[0].mxu0 }
  0xf9   :  { %v184_v53 = vadd.f32 %v183_v3, %v1071_v49  ;;  %v296_v54 = vpop.f32.mrb[0].mxu1  ;;  %v185_v55 = vpop.f32.mrb[1].mxu0 }
  0xfa   :  { %v297_v56 = vadd.f32 %v296_v54, %v1073_v50  ;;  %v186_v57 = vadd.f32 %v185_v55, %v1075_v51  ;;  %v298_v58 = vpop.f32.mrb[1].mxu1 }
  0xfb   :  { %343 = vst [vmem:[#allocation4] sm:$0xff] %v184_v53  ;;  %v299_v59 = vadd.f32 %v298_v58, %v1077_v52 }
  0xfc   :  { %345 = vst [vmem:[#allocation4 + $0x10] sm:$0xff] %v297_v56  ;;  %344 = vst [vmem:[#allocation4 + $0x8] sm:$0xff] %v186_v57  ;;  %v189_v60 = vpop.f32.mrb[2].mxu0 }
  0xfd   :  { %346 = vst [vmem:[#allocation4 + $0x18] sm:$0xff] %v299_v59  ;;  %v190_v61 = vadd.f32 %v189_v60, %v1071_v49  ;;  %v302_v62 = vpop.f32.mrb[2].mxu1  ;;  %v191_v63 = vpop.f32.mrb[3].mxu0 }
  0xfe   :  { %v303_v0 = vadd.f32 %v302_v62, %v1073_v50  ;;  %v192_v1 = vadd.f32 %v191_v63, %v1075_v51  ;;  %v304_v2 = vpop.f32.mrb[3].mxu1 }
  0xff   :  { %347 = vst [vmem:[#allocation4 + $0x20] sm:$0xff] %v190_v61  ;;  %v305_v4 = vadd.f32 %v304_v2, %v1077_v52 }
 0x100   :  { %349 = vst [vmem:[#allocation4 + $0x30] sm:$0xff] %v303_v0  ;;  %348 = vst [vmem:[#allocation4 + $0x28] sm:$0xff] %v192_v1  ;;  %v195_v5 = vpop.f32.mrb[4].mxu0 }
 0x101   :  { %350 = vst [vmem:[#allocation4 + $0x38] sm:$0xff] %v305_v4  ;;  %v196_v6 = vadd.f32 %v195_v5, %v1071_v49  ;;  %v308_v7 = vpop.f32.mrb[4].mxu1  ;;  %v197_v8 = vpop.f32.mrb[5].mxu0 }
 0x102   :  { %v309_v9 = vadd.f32 %v308_v7, %v1073_v50  ;;  %v198_v10 = vadd.f32 %v197_v8, %v1075_v51  ;;  %v310_v11 = vpop.f32.mrb[5].mxu1 }
 0x103   :  { %351 = vst [vmem:[#allocation4 + $0x40] sm:$0xff] %v196_v6  ;;  %v311_v12 = vadd.f32 %v310_v11, %v1077_v52 }
 0x104   :  { %353 = vst [vmem:[#allocation4 + $0x50] sm:$0xff] %v309_v9  ;;  %352 = vst [vmem:[#allocation4 + $0x48] sm:$0xff] %v198_v10  ;;  %v201_v13 = vpop.f32.mrb[6].mxu0 }
 0x105   :  { %354 = vst [vmem:[#allocation4 + $0x58] sm:$0xff] %v311_v12  ;;  %v202_v14 = vadd.f32 %v201_v13, %v1071_v49  ;;  %v314_v15 = vpop.f32.mrb[6].mxu1  ;;  %v203_v16 = vpop.f32.mrb[7].mxu0 }
 0x106   :  { %v315_v17 = vadd.f32 %v314_v15, %v1073_v50  ;;  %v204_v18 = vadd.f32 %v203_v16, %v1075_v51  ;;  %v316_v19 = vpop.f32.mrb[7].mxu1 }
 0x107   :  { %355 = vst [vmem:[#allocation4 + $0x60] sm:$0xff] %v202_v14  ;;  %v317_v20 = vadd.f32 %v316_v19, %v1077_v52 }
 0x108   :  { %357 = vst [vmem:[#allocation4 + $0x70] sm:$0xff] %v315_v17  ;;  %356 = vst [vmem:[#allocation4 + $0x68] sm:$0xff] %v204_v18  ;;  %v207_v21 = vpop.f32.mrb[8].mxu0 }
 0x109   :  { %358 = vst [vmem:[#allocation4 + $0x78] sm:$0xff] %v317_v20  ;;  %v208_v22 = vadd.f32 %v207_v21, %v1071_v49  ;;  %v320_v23 = vpop.f32.mrb[8].mxu1  ;;  %v209_v24 = vpop.f32.mrb[9].mxu0 }
 0x10a   :  { %v321_v25 = vadd.f32 %v320_v23, %v1073_v50  ;;  %v210_v26 = vadd.f32 %v209_v24, %v1075_v51  ;;  %v322_v27 = vpop.f32.mrb[9].mxu1 }
 0x10b   :  { %359 = vst [vmem:[#allocation4 + $0x80] sm:$0xff] %v208_v22  ;;  %v323_v28 = vadd.f32 %v322_v27, %v1077_v52 }
 0x10c   :  { %361 = vst [vmem:[#allocation4 + $0x90] sm:$0xff] %v321_v25  ;;  %360 = vst [vmem:[#allocation4 + $0x88] sm:$0xff] %v210_v26  ;;  %v213_v29 = vpop.f32.mrb[10].mxu0 }
 0x10d   :  { %362 = vst [vmem:[#allocation4 + $0x98] sm:$0xff] %v323_v28  ;;  %v214_v30 = vadd.f32 %v213_v29, %v1071_v49  ;;  %v326_v31 = vpop.f32.mrb[10].mxu1  ;;  %v215_v32 = vpop.f32.mrb[11].mxu0 }
 0x10e   :  { %v327_v33 = vadd.f32 %v326_v31, %v1073_v50  ;;  %v216_v34 = vadd.f32 %v215_v32, %v1075_v51  ;;  %v328_v35 = vpop.f32.mrb[11].mxu1 }
 0x10f   :  { %363 = vst [vmem:[#allocation4 + $0xa0] sm:$0xff] %v214_v30  ;;  %v329_v36 = vadd.f32 %v328_v35, %v1077_v52 }
 0x110   :  { %365 = vst [vmem:[#allocation4 + $0xb0] sm:$0xff] %v327_v33  ;;  %364 = vst [vmem:[#allocation4 + $0xa8] sm:$0xff] %v216_v34  ;;  %v219_v37 = vpop.f32.mrb[12].mxu0 }
 0x111   :  { %366 = vst [vmem:[#allocation4 + $0xb8] sm:$0xff] %v329_v36  ;;  %v220_v38 = vadd.f32 %v219_v37, %v1071_v49  ;;  %v332_v39 = vpop.f32.mrb[12].mxu1  ;;  %v221_v40 = vpop.f32.mrb[13].mxu0 }
 0x112   :  { %v333_v41 = vadd.f32 %v332_v39, %v1073_v50  ;;  %v222_v42 = vadd.f32 %v221_v40, %v1075_v51  ;;  %v334_v43 = vpop.f32.mrb[13].mxu1 }
 0x113   :  { %367 = vst [vmem:[#allocation4 + $0xc0] sm:$0xff] %v220_v38  ;;  %v335_v44 = vadd.f32 %v334_v43, %v1077_v52 }
 0x114   :  { %369 = vst [vmem:[#allocation4 + $0xd0] sm:$0xff] %v333_v41  ;;  %368 = vst [vmem:[#allocation4 + $0xc8] sm:$0xff] %v222_v42  ;;  %v225_v45 = vpop.f32.mrb[14].mxu0 }
 0x115   :  { %370 = vst [vmem:[#allocation4 + $0xd8] sm:$0xff] %v335_v44  ;;  %v226_v46 = vadd.f32 %v225_v45, %v1071_v49  ;;  %v338_v47 = vpop.f32.mrb[14].mxu1  ;;  %v227_v48 = vpop.f32.mrb[15].mxu0 }
 0x116   :  { %v339_v3 = vadd.f32 %v338_v47, %v1073_v50  ;;  %v228_v53 = vadd.f32 %v227_v48, %v1075_v51  ;;  %v340_v54 = vpop.f32.mrb[15].mxu1 }
 0x117   :  { %371 = vst [vmem:[#allocation4 + $0xe0] sm:$0xff] %v226_v46  ;;  %v341_v55 = vadd.f32 %v340_v54, %v1077_v52 }
 0x118   :  { %373 = vst [vmem:[#allocation4 + $0xf0] sm:$0xff] %v339_v3  ;;  %372 = vst [vmem:[#allocation4 + $0xe8] sm:$0xff] %v228_v53 }
 0x119   :  { %374 = vst [vmem:[#allocation4 + $0xf8] sm:$0xff] %v341_v55 }
 0x11a LB: > { %v383_v49 = vld [vmem:[%s1317_s2 + $0x8] sm:$0xff]  ;;  %v382_v51 = vld [vmem:[%s1317_s2] sm:$0xff]  ;;  %v808_v59 = vmov 0.0   ;;  %v385_v8 = vld [vmem:[%s1317_s2 + $0x18] sm:$0xff]  ;;  %s644_s18 = sshll.u32 %s805_s0, 5  ;;  %s643_s20 = sshll.u32 %s805_s0, 3  ;;  %s805_s0 = sphi %s1111_s0, %s380_s0  }
 0x11b   : > { %v387_v50 = vld [vmem:[%s1317_s2 + $0x28] sm:$0xff]  ;;  %v386_v56 = vld [vmem:[%s1317_s2 + $0x20] sm:$0xff]  ;;  %517 = vmatprep.mubr.f32.mxu0 %v808_v59  ;;  %588 = vmatprep.mubr.f32.mxu1 %v808_v59  ;;  %v389_v9 = vld [vmem:[%s1317_s2 + $0x38] sm:$0xff]  ;;  %s448_s19 = scalar_lea.vmem [#allocation4], %s644_s18  ;;  %s623_s23 = scalar_lea.vmem %s1318_s4, %s643_s20 }
 0x11c   : > { %v709_v52 = vpack.c.bf16 %v387_v50, %v383_v49  ;;  %v391_v57 = vld [vmem:[%s1317_s2 + $0x48] sm:$0xff]  ;;  %v711_v60 = vpack.c.bf16 %v386_v56, %v382_v51  ;;  %v390_v62 = vld [vmem:[%s1317_s2 + $0x40] sm:$0xff]  ;;  %v741_v11 = vpack.c.bf16 %v389_v9, %v385_v8  ;;  %v384_v12 = vld [vmem:[%s1317_s2 + $0x10] sm:$0xff]  ;;  %s380_s0 = sadd.s32 1, %s805_s0  }
 0x11d   : > { %v395_v58 = vld [vmem:[%s1317_s2 + $0x68] sm:$0xff]  ;;  %v394_v63 = vld [vmem:[%s1317_s2 + $0x60] sm:$0xff]  ;;  %v388_v13 = vld [vmem:[%s1317_s2 + $0x30] sm:$0xff]  ;;  %p377_p0 = scmp.ge.s32.totalorder %s380_s0, 8  }
 0x11e   : > { %v713_v61 = vpack.c.bf16 %v395_v58, %v391_v57  ;;  %v399_v0 = vld [vmem:[%s1317_s2 + $0x88] sm:$0xff]  ;;  %710 = vmatprep.subr.bf16.mxu0 %v709_v52  ;;  %v715_v2 = vpack.c.bf16 %v394_v63, %v390_v62  ;;  %v398_v4 = vld [vmem:[%s1317_s2 + $0x80] sm:$0xff]  ;;  %v743_v14 = vpack.c.bf16 %v388_v13, %v384_v12  ;;  %742 = vmatprep.subr.bf16.mxu1 %v741_v11  ;;  %v393_v16 = vld [vmem:[%s1317_s2 + $0x58] sm:$0xff] }
 0x11f   : > { %v403_v1 = vld [vmem:[%s1317_s2 + $0xa8] sm:$0xff]  ;;  %712 = vmatpush1.bf16.msra.mxu0 %v711_v60  ;;  %v402_v5 = vld [vmem:[%s1317_s2 + $0xa0] sm:$0xff]  ;;  %v397_v17 = vld [vmem:[%s1317_s2 + $0x78] sm:$0xff] }
 0x120   : > { %714 = vmatprep.subr.bf16.mxu0 %v713_v61  ;;  %v717_v6 = vpack.c.bf16 %v403_v1, %v399_v0  ;;  %v407_v7 = vld [vmem:[%s1317_s2 + $0xc8] sm:$0xff]  ;;  %v719_v15 = vpack.c.bf16 %v402_v5, %v398_v4  ;;  %v392_v18 = vld [vmem:[%s1317_s2 + $0x50] sm:$0xff]  ;;  %v406_v20 = vld [vmem:[%s1317_s2 + $0xc0] sm:$0xff]  ;;  %744 = vmatpush1.bf16.msra.mxu1 %v743_v14  ;;  %v745_v22 = vpack.c.bf16 %v397_v17, %v393_v16 }
 0x121   : > { %v411_v10 = vld [vmem:[%s1317_s2 + $0xe8] sm:$0xff]  ;;  %v410_v21 = vld [vmem:[%s1317_s2 + $0xe0] sm:$0xff]  ;;  %v396_v23 = vld [vmem:[%s1317_s2 + $0x70] sm:$0xff] }
 0x122   : > { %v721_v19 = vpack.c.bf16 %v411_v10, %v407_v7  ;;  %v415_v24 = vld [vmem:[%s1317_s2 + $0x108] sm:$0xff]  ;;  %v747_v26 = vpack.c.bf16 %v396_v23, %v392_v18  ;;  %v401_v27 = vld [vmem:[%s1317_s2 + $0x98] sm:$0xff]  ;;  %746 = vmatprep.subr.bf16.mxu1 %v745_v22  ;;  %v400_v29 = vld [vmem:[%s1317_s2 + $0x90] sm:$0xff]  ;;  %v723_v31 = vpack.c.bf16 %v410_v21, %v406_v20 }
 0x123   : > { %716 = vmatpush1.bf16.msra.mxu0 %v715_v2  ;;  %v419_v25 = vld [vmem:[%s1317_s2 + $0x128] sm:$0xff]  ;;  %v405_v28 = vld [vmem:[%s1317_s2 + $0xb8] sm:$0xff]  ;;  %v404_v30 = vld [vmem:[%s1317_s2 + $0xb0] sm:$0xff] }
 0x124   : > { %718 = vmatprep.subr.bf16.mxu0 %v717_v6  ;;  %v414_v32 = vld [vmem:[%s1317_s2 + $0x100] sm:$0xff]  ;;  %v749_v34 = vpack.c.bf16 %v405_v28, %v401_v27  ;;  %v725_v35 = vpack.c.bf16 %v419_v25, %v415_v24  ;;  %748 = vmatpush1.bf16.msra.mxu1 %v747_v26  ;;  %v423_v36 = vld [vmem:[%s1317_s2 + $0x148] sm:$0xff]  ;;  %v751_v37 = vpack.c.bf16 %v404_v30, %v400_v29  ;;  %v409_v38 = vld [vmem:[%s1317_s2 + $0xd8] sm:$0xff] }
 0x125   : > { %v418_v33 = vld [vmem:[%s1317_s2 + $0x120] sm:$0xff]  ;;  %v413_v39 = vld [vmem:[%s1317_s2 + $0xf8] sm:$0xff]  ;;  %v427_v40 = vld [vmem:[%s1317_s2 + $0x168] sm:$0xff] }
 0x126   : > { %750 = vmatprep.subr.bf16.mxu1 %v749_v34  ;;  %v753_v41 = vpack.c.bf16 %v413_v39, %v409_v38  ;;  %v408_v42 = vld [vmem:[%s1317_s2 + $0xd0] sm:$0xff]  ;;  %v727_v44 = vpack.c.bf16 %v418_v33, %v414_v32  ;;  %v417_v45 = vld [vmem:[%s1317_s2 + $0x118] sm:$0xff]  ;;  %v729_v47 = vpack.c.bf16 %v427_v40, %v423_v36  ;;  %v422_v48 = vld [vmem:[%s1317_s2 + $0x140] sm:$0xff] }
 0x127   : > { %720 = vmatpush1.bf16.msra.mxu0 %v719_v15  ;;  %v412_v43 = vld [vmem:[%s1317_s2 + $0xf0] sm:$0xff]  ;;  %v421_v46 = vld [vmem:[%s1317_s2 + $0x138] sm:$0xff]  ;;  %v426_v3 = vld [vmem:[%s1317_s2 + $0x160] sm:$0xff] }
 0x128   : > { %722 = vmatprep.subr.bf16.mxu0 %v721_v19  ;;  %752 = vmatpush1.bf16.msra.mxu1 %v751_v37  ;;  %v431_v53 = vld [vmem:[%s1317_s2 + $0x188] sm:$0xff]  ;;  %v755_v54 = vpack.c.bf16 %v412_v43, %v408_v42  ;;  %v757_v49 = vpack.c.bf16 %v421_v46, %v417_v45  ;;  %v416_v50 = vld [vmem:[%s1317_s2 + $0x110] sm:$0xff]  ;;  %v425_v52 = vld [vmem:[%s1317_s2 + $0x158] sm:$0xff]  ;;  %v731_v57 = vpack.c.bf16 %v426_v3, %v422_v48 }
 0x129   : > { %v435_v55 = vld [vmem:[%s1317_s2 + $0x1a8] sm:$0xff]  ;;  %754 = vmatprep.subr.bf16.mxu1 %v753_v41  ;;  %v420_v51 = vld [vmem:[%s1317_s2 + $0x130] sm:$0xff]  ;;  %v429_v56 = vld [vmem:[%s1317_s2 + $0x178] sm:$0xff] }
 0x12a   : > { %v733_v58 = vpack.c.bf16 %v435_v55, %v431_v53  ;;  %v430_v59 = vld [vmem:[%s1317_s2 + $0x180] sm:$0xff]  ;;  %v439_v61 = vld [vmem:[%s1317_s2 + $0x1c8] sm:$0xff]  ;;  %v759_v62 = vpack.c.bf16 %v420_v51, %v416_v50  ;;  %v761_v0 = vpack.c.bf16 %v429_v56, %v425_v52  ;;  %v424_v1 = vld [vmem:[%s1317_s2 + $0x150] sm:$0xff] }
 0x12b   : > { %724 = vmatpush1.bf16.msra.mxu0 %v723_v31  ;;  %v434_v60 = vld [vmem:[%s1317_s2 + $0x1a0] sm:$0xff]  ;;  %v443_v63 = vld [vmem:[%s1317_s2 + $0x1e8] sm:$0xff]  ;;  %v428_v2 = vld [vmem:[%s1317_s2 + $0x170] sm:$0xff] }
 0x12c   : > { %726 = vmatprep.subr.bf16.mxu0 %v725_v35  ;;  %756 = vmatpush1.bf16.msra.mxu1 %v755_v54  ;;  %v433_v4 = vld [vmem:[%s1317_s2 + $0x198] sm:$0xff]  ;;  %v735_v6 = vpack.c.bf16 %v434_v60, %v430_v59  ;;  %v737_v7 = vpack.c.bf16 %v443_v63, %v439_v61  ;;  %v438_v8 = vld [vmem:[%s1317_s2 + $0x1c0] sm:$0xff]  ;;  %v763_v10 = vpack.c.bf16 %v428_v2, %v424_v1  ;;  %v432_v12 = vld [vmem:[%s1317_s2 + $0x190] sm:$0xff] }
 0x12d   : > { %758 = vmatprep.subr.bf16.mxu1 %v757_v49  ;;  %v437_v5 = vld [vmem:[%s1317_s2 + $0x1b8] sm:$0xff]  ;;  %v442_v9 = vld [vmem:[%s1317_s2 + $0x1e0] sm:$0xff]  ;;  %v436_v13 = vld [vmem:[%s1317_s2 + $0x1b0] sm:$0xff] }
 0x12e   : > { %v765_v11 = vpack.c.bf16 %v437_v5, %v433_v4  ;;  %v441_v14 = vld [vmem:[%s1317_s2 + $0x1d8] sm:$0xff]  ;;  %v739_v16 = vpack.c.bf16 %v442_v9, %v438_v8  ;;  %v767_v17 = vpack.c.bf16 %v436_v13, %v432_v12  ;;  %v440_v19 = vld [vmem:[%s1317_s2 + $0x1d0] sm:$0xff]  ;;  %v381_v21 = vld [vmem:[#allocation2] sm:$0xff] }
 0x12f   : > { %728 = vmatpush1.bf16.msra.mxu0 %v727_v44  ;;  %v445_v15 = vld [vmem:[%s1317_s2 + $0x1f8] sm:$0xff]  ;;  %v444_v20 = vld [vmem:[%s1317_s2 + $0x1f0] sm:$0xff]  ;;  %v449_v23 = vld [vmem:[%s448_s19] sm:$0xff] }
 0x130   : > { %730 = vmatprep.subr.bf16.mxu0 %v729_v47  ;;  %760 = vmatpush1.bf16.msra.mxu1 %v759_v62  ;;  %v769_v18 = vpack.c.bf16 %v445_v15, %v441_v14  ;;  %v771_v22 = vpack.c.bf16 %v444_v20, %v440_v19  ;;  %v450_v24 = vld [vmem:[%s448_s19 + $0x8] sm:$0xff]  ;;  %v452_v31 = vld [vmem:[%s448_s19 + $0x18] sm:$0xff]  ;;  %v451_v35 = vld [vmem:[%s448_s19 + $0x10] sm:$0xff] }
 0x131   : > { %762 = vmatprep.subr.bf16.mxu1 %v761_v0  ;;  %v614_v44 = vld [vmem:[#allocation3] sm:$0xff] }
 0x133   : > { %732 = vmatpush1.bf16.msra.mxu0 %v731_v57 }
 0x134   : > { %734 = vmatprep.subr.bf16.mxu0 %v733_v58  ;;  %764 = vmatpush1.bf16.msra.mxu1 %v763_v10 }
 0x135   : > { %766 = vmatprep.subr.bf16.mxu1 %v765_v11 }
 0x137   : > { %736 = vmatpush1.bf16.msra.mxu0 %v735_v6 }
 0x138   : > { %738 = vmatprep.subr.bf16.mxu0 %v737_v7  ;;  %768 = vmatpush1.bf16.msra.mxu1 %v767_v17 }
 0x139   : > { %770 = vmatprep.subr.bf16.mxu1 %v769_v18 }
 0x13b   : > { %740 = vmatpush1.bf16.msra.mxu0 %v739_v16 }
 0x13c   : > { %772 = vmatpush1.bf16.msra.mxu1 %v771_v22 }
 0x13e   : > { %518 = vmatmul.mubr.f32.vlgmr.msra.gmra.mrb[0].mxu0 %v381_v21 }
 0x13f   : > { %589 = vmatmul.mubr.f32.vlgmr.msra.gmra.mrb[0].mxu1 %v381_v21 }
 0x211   : > { %v519_v25 = vpop.f32.mrb[0].mxu0 }
 0x212   : > { %v520_v26 = vadd.f32 %v519_v25, %v449_v23  ;;  %v521_v27 = vpop.f32.mrb[1].mxu0  ;;  %v590_v32 = vpop.f32.mrb[0].mxu1 }
 0x213   : > { %v522_v28 = vadd.f32 %v521_v27, %v450_v24  ;;  %v592_v33 = vpop.f32.mrb[1].mxu1  ;;  %v591_v37 = vadd.f32 %v590_v32, %v451_v35 }
 0x214   : > { %v640_v29 = vmul.f32 -1.442695, %v520_v26  ;;  %v593_v34 = vadd.f32 %v592_v33, %v452_v31 }
 0x215   : > { %v641_v30 = vmul.f32 -1.442695, %v522_v28 }
 0x216   : > { %783 = vpow2.f32 %v640_v29  ;;  %v642_v36 = vmul.f32 -1.442695, %v593_v34 }
 0x217   : > { %785 = vpow2.f32 %v641_v30 }
 0x218   : > { %787 = vpow2.f32 %v642_v36 }
 0x219   : > { %789 = vtanh.f32 %v591_v37 }
 0x220   : > { %v784_v38 = vpop.eup %783 }
 0x221   : > { %v786_v39 = vpop.eup %785  ;;  %v598_v40 = vadd.f32 1.0, %v784_v38 }
 0x222   : > { %v604_v41 = vadd.f32 1.0, %v786_v39  ;;  %v788_v42 = vpop.eup %787 }
 0x223   : > { %791 = vrcp.f32 %v598_v40  ;;  %v790_v43 = vpop.eup %789  ;;  %v611_v46 = vadd.f32 1.0, %v788_v42 }
 0x224   : > { %793 = vrcp.f32 %v604_v41 }
 0x225   : > { %795 = vrcp.f32 %v611_v46 }
 0x22d   : > { %v792_v45 = vpop.eup %791 }
 0x22e   : > { %v794_v47 = vpop.eup %793  ;;  %v616_v48 = vmul.f32 %v792_v45, %v790_v43 }
 0x22f   : > { %v615_v3 = vmul.f32 %v794_v47, %v614_v44  ;;  %v796_v54 = vpop.eup %795 }
 0x231   : > { %v617_v53 = vadd.f32 %v616_v48, %v615_v3 }
 0x233   : > { %797 = vtanh.f32 %v617_v53  ;;  %620 = vst [vmem:[#allocation3] sm:$0xff] %v617_v53 }
 0x23a   :  { %379 = sbr.rel (!%p377_p0) target bundleno = 282 (0x11a), region = 49 }
 0x23d   : > { %v798_v55 = vpop.eup %797 }
 0x23e   : > { %v619_v49 = vmul.f32 %v798_v55, %v796_v54 }
 0x240   : > { %621 = vst [vmem:[#allocation2] sm:$0xff] %v619_v49  ;;  %624 = vst [vmem:[%s623_s23] sm:$0xff] %v619_v49 }

</bundles_post_ra>
